<compile_context>
chip_gen: v5e
topology: v5e:2x2
jax: 0.10.0
libtpu: 0.0.40
codegen_flags: <defaults>
</compile_context>

<pallas_src>
import jax
import jax.numpy as jnp
from jax.experimental import pallas as pl
from jax.experimental.pallas import tpu as pltpu


def _round_up(a: int, b: int) -> int:
    return ((a + b - 1) // b) * b


def _make_kernel(true_l: int, tile_l: int, init_val):
    needs_mask = (true_l % tile_l) != 0

    def kernel(x_ref, o_ref, acc_ref):
        k = pl.program_id(1)

        @pl.when(k == 0)
        def _init():
            acc_ref[...] = jnp.full(acc_ref.shape, init_val, acc_ref.dtype)

        x = x_ref[...]
        if needs_mask:
            # Mask padded lanes of the (partial) last L tile to the identity of max.
            lane = jax.lax.broadcasted_iota(jnp.int32, x.shape, 1)
            valid = (k * tile_l + lane) < true_l
            x = jnp.where(valid, x, jnp.full(x.shape, init_val, x.dtype))

        # Elementwise running max: stays on the VPU, no per-tile XLU reduce.
        acc_ref[...] = jnp.maximum(acc_ref[...], x)

        @pl.when(k == pl.num_programs(1) - 1)
        def _finalize():
            # Single cross-lane (XLU) reduction per row block, amortized over L.
            o_ref[...] = jnp.max(acc_ref[...], axis=-1, keepdims=True).astype(o_ref.dtype)

    return kernel


def global_max_pool1d(x: jax.Array) -> jax.Array:
    """x: (N, C, L) -> (N, C, 1), max over L. Same as F.max_pool1d(x, x.shape[2])."""
    N, C, L = x.shape
    R = N * C
    x2 = x.reshape(R, L)  # contiguous leading-dim merge: free reshape, no copy

    itemsize = jnp.dtype(x.dtype).itemsize
    sub = {4: 8, 2: 16, 1: 32}.get(itemsize, 8)  # sublane packing per dtype

    # Lane tile: multiple of 128, large enough to stream HBM near roofline.
    tL = min(_round_up(L, 128), 2048)
    # Row tile: multiple of sublane packing, capped so one tile is ~<=4 MiB
    # (=> <= ~12 MiB live VMEM with double-buffered input + accumulator).
    max_tr = max(sub, ((4 << 20) // (tL * itemsize)) // sub * sub)
    tR = min(_round_up(R, sub), max_tr, 1024)

    if jnp.issubdtype(x.dtype, jnp.floating):
        init_val = -jnp.inf
    elif jnp.issubdtype(x.dtype, jnp.integer):
        init_val = jnp.iinfo(x.dtype).min
    else:
        raise TypeError(f"unsupported dtype {x.dtype}")

    kernel = _make_kernel(L, tL, init_val)

    out2 = pl.pallas_call(
        kernel,
        out_shape=jax.ShapeDtypeStruct((R, 1), x.dtype),
        grid_spec=pltpu.PrefetchScalarGridSpec(
            num_scalar_prefetch=0,
            grid=(pl.cdiv(R, tR), pl.cdiv(L, tL)),
            in_specs=[pl.BlockSpec((tR, tL), lambda r, k: (r, k))],
            out_specs=pl.BlockSpec((tR, 1), lambda r, k: (r, 0)),
            scratch_shapes=[pltpu.VMEM((tR, tL), x.dtype)],
        ),
        compiler_params=pltpu.CompilerParams(
            dimension_semantics=("parallel", "arbitrary"),
        ),
    )(x2)

    return out2.reshape(N, C, 1)


if __name__ == "__main__":
    key = jax.random.PRNGKey(0)

    # Primary small-shape check consistent with the module: batch=2, channels=4, length=16.
    N, C, L = 2, 4, 16
    x = jax.random.normal(key, (N, C, L), dtype=jnp.float32)
    out = jax.block_until_ready(global_max_pool1d(x))
    ref = jnp.max(x, axis=-1, keepdims=True)
    assert out.shape == (N, C, 1), out.shape
    assert jnp.allclose(out, ref), "mismatch vs reference (small shape)"

    # Extra check: ragged rows + multiple L tiles exercise accumulator init/masking.
    x2 = jax.random.normal(jax.random.PRNGKey(1), (2, 3, 2500), dtype=jnp.float32)
    out2 = jax.block_until_ready(global_max_pool1d(x2))
    ref2 = jnp.max(x2, axis=-1, keepdims=True)
    assert out2.shape == (2, 3, 1), out2.shape
    assert jnp.allclose(out2, ref2), "mismatch vs reference (ragged shape)"

    print("KERNEL_OK")
</pallas_src>

<mosaic_0001>
module attributes {stable_mosaic.version = 11 : i64} {
  func.func @kernel(%arg0: i32, %arg1: i32, %arg2: memref<8x128xf32, #tpu.memory_space<vmem>>, %arg3: memref<8x1xf32, #tpu.memory_space<vmem>>, %arg4: memref<8x128xf32, #tpu.memory_space<vmem>>) attributes {dimension_semantics = [#tpu.dimension_semantics<parallel>, #tpu.dimension_semantics<arbitrary>], iteration_bounds = array<i64: 1, 1>, scalar_prefetch = 0 : i64, scratch_operands = 1 : i64, tpu.core_type = #tpu.core_type<tc>, window_params = [{transform_indices = @transform_0, window_bounds = array<i64: 8, 128>}, {transform_indices = @transform_1, window_bounds = array<i64: 8, 1>}]} {
    %c0_i32 = arith.constant 0 : i32
    %0 = arith.cmpi eq, %arg1, %c0_i32 : i32
    %1 = arith.extui %0 : i1 to i32
    %c0_i32_0 = arith.constant 0 : i32
    %2 = arith.cmpi ne, %1, %c0_i32_0 : i32
    scf.if %2 {
      %cst_8 = arith.constant 0xFF800000 : f32
      %18 = vector.broadcast %cst_8 : f32 to vector<8x128xf32>
      %c0_9 = arith.constant 0 : index
      %c0_10 = arith.constant 0 : index
      %19 = vector.load %arg4[%c0_9, %c0_10] : memref<8x128xf32, #tpu.memory_space<vmem>>, vector<8x128xf32>
      tpu.vector_store %arg4[%c0_9, %c0_10], %18 {strides = array<i32>} : memref<8x128xf32, #tpu.memory_space<vmem>>, vector<8x128xf32>,
    } else {
    }
    %c0 = arith.constant 0 : index
    %c0_1 = arith.constant 0 : index
    %3 = vector.load %arg2[%c0, %c0_1] : memref<8x128xf32, #tpu.memory_space<vmem>>, vector<8x128xf32>
    %4 = tpu.iota {dimensions = array<i32: 1>} : vector<8x128xi32>
    %c128_i32 = arith.constant 128 : i32
    %5 = arith.muli %arg1, %c128_i32 : i32
    %6 = vector.broadcast %5 : i32 to vector<8x128xi32>
    %7 = arith.addi %6, %4 : vector<8x128xi32>
    %c16_i32 = arith.constant 16 : i32
    %8 = vector.broadcast %c16_i32 : i32 to vector<8x128xi32>
    %9 = arith.cmpi slt, %7, %8 : vector<8x128xi32>
    %cst = arith.constant 0xFF800000 : f32
    %10 = vector.broadcast %cst : f32 to vector<8x128xf32>
    %11 = arith.select %9, %3, %10 : vector<8x128xi1>, vector<8x128xf32>
    %c0_2 = arith.constant 0 : index
    %c0_3 = arith.constant 0 : index
    %12 = vector.load %arg4[%c0_2, %c0_3] : memref<8x128xf32, #tpu.memory_space<vmem>>, vector<8x128xf32>
    %13 = arith.maximumf %12, %11 : vector<8x128xf32>
    %c0_4 = arith.constant 0 : index
    %c0_5 = arith.constant 0 : index
    %14 = vector.load %arg4[%c0_4, %c0_5] : memref<8x128xf32, #tpu.memory_space<vmem>>, vector<8x128xf32>
    tpu.vector_store %arg4[%c0_4, %c0_5], %13 {strides = array<i32>} : memref<8x128xf32, #tpu.memory_space<vmem>>, vector<8x128xf32>,
    %c0_i32_6 = arith.constant 0 : i32
    %15 = arith.cmpi eq, %arg1, %c0_i32_6 : i32
    %16 = arith.extui %15 : i1 to i32
    %c0_i32_7 = arith.constant 0 : i32
    %17 = arith.cmpi ne, %16, %c0_i32_7 : i32
    scf.if %17 {
      %c0_8 = arith.constant 0 : index
      %c0_9 = arith.constant 0 : index
      %18 = vector.load %arg4[%c0_8, %c0_9] : memref<8x128xf32, #tpu.memory_space<vmem>>, vector<8x128xf32>
      %cst_10 = arith.constant dense<0xFF800000> : vector<8xf32>
      %19 = vector.multi_reduction <maximumf>, %18, %cst_10 [1] : vector<8x128xf32> to vector<8xf32>
      %20 = vector.shape_cast %19 : vector<8xf32> to vector<8x1xf32>
      %c0_11 = arith.constant 0 : index
      %c0_12 = arith.constant 0 : index
      %21 = vector.load %arg3[%c0_11, %c0_12] : memref<8x1xf32, #tpu.memory_space<vmem>>, vector<8x1xf32>
      tpu.vector_store %arg3[%c0_11, %c0_12], %20 {strides = array<i32>} : memref<8x1xf32, #tpu.memory_space<vmem>>, vector<8x1xf32>,
    } else {
    }
    return
  }
  func.func @transform_0(%arg0: i32, %arg1: i32) -> (i32, i32) {
    %c0_i32 = arith.constant 0 : i32
    return %arg0, %arg1 : i32, i32
  }
  func.func @transform_1(%arg0: i32, %arg1: i32) -> (i32, i32) {
    %c0_i32 = arith.constant 0 : i32
    %c0_i32_0 = arith.constant 0 : i32
    return %arg0, %c0_i32 : i32, i32
  }
}

</mosaic_0001>

<bundles_post_ra>
// kernel: tpu_custom_call.1
= control target key start
LH: loop header
LB: loop body
LE: loop exit
PB: predicated region body
PF: predicated region fallthrough
CT: control target
= control target key end

     0   :  { %6 = vsyncpa [#allocation4], 0  ;;  %s78_s9 = smov [#allocation3]   ;;  %s95_s0 = inlined_call_operand.hbm [shape: f32[8,16], index: 0, kind: input, shape index: {}]   ;;  %s96_s1 = inlined_call_operand.vmem [shape: f32[8,1], index: 1, kind: output, shape index: {}]  }
   0x1   :  { %s12_s8 = sshll.u32 %s95_s0, 4  ;;  %s14_s10 = sshll.u32 %s78_s9, 4  ;;  %s13_s8 = int_to_ptr.hbm [resolvable:$true] %s12_s8  ;;  %s15_s10 = int_to_ptr.vmem [resolvable:$true] %s14_s10 }
   0x2   :  { %17 = dma.hbm_to_vmem [thread:$0]  %s13_s8, 128, %s15_s10, [#allocation4]  }
   0x3   :  { %76 = dma.done.wait [#allocation4], 128  }
   0x4   :  { %77 = vsyncadd [#allocation4], 4294967168  ;;  %v28_v0 = vlaneseq  ;;  %v27_v2 = vld [vmem:[#allocation3] sm:$0xff]  ;;  %vm44_vm1 = vcmask 7168  }
   0x6   :  { %v29_v1 = vand.u32 127, %v28_v0 }
   0x8   :  { %vm33_vm0 = vcmp.lt.s32.totalorder %v29_v1, 16 }
   0x9   :  { %v34_v3 = vsel %vm33_vm0, %v27_v2, -inf }
   0xa   :  { %42 = vmax.xlane.f32.xlu0 %v34_v3 }
  0x7d   :  { %v43_v4 = vpop.xlane.xlu0 %42 }
  0x7e   :  { %45 = vst.msk [vmem:[%s96_s1] sm:$0xff] %vm44_vm1, %v43_v4 }
  0x7f   :  { %50 = vsyncpa [#allocation4], 1 }

</bundles_post_ra>
